<compile_context>
chip_gen: v6e
topology: v6e:2x2x1
jax: 0.10.0
libtpu: 0.0.40
codegen_flags: <defaults>
</compile_context>

<pallas_src>
import math

import jax
import jax.numpy as jnp
import numpy as np
from jax import lax
from jax.experimental import pallas as pl
from jax.experimental.pallas import tpu as pltpu


def _round_up(x, mult):
    return (x + mult - 1) // mult * mult


def _make_kernels(s, m, easy_margin, tn):
    cos_m = math.cos(m)
    sin_m = math.sin(m)
    th = math.cos(math.pi - m)
    mm = math.sin(math.pi - m) * m
    # Fold the trailing "* s" into the epilogue constants (saves one full-tile mul).
    s_cos_m = s * cos_m
    s_sin_m = s * sin_m
    s_mm = s * mm

    def _cosine(xn_ref, wn_ref):
        # Inputs are pre-normalized in the wrapper: this is a pure MXU matmul
        # in canonical (tm, K) x (K, tn) form with f32 accumulation.
        return jnp.dot(xn_ref[...], wn_ref[...],
                       preferred_element_type=jnp.float32)

    def train_kernel(xn_ref, wn_ref, label_ref, out_ref):
        cosine = _cosine(xn_ref, wn_ref)                     # (tm, tn) f32
        scaled = cosine * s                                  # s * cos(theta)
        sine = jnp.sqrt(jnp.maximum(1.0 - cosine * cosine, 0.0))
        phi_s = cosine * s_cos_m - sine * s_sin_m            # s * cos(theta+m)
        if easy_margin:
            phi_s = jnp.where(cosine > 0.0, phi_s, scaled)
        else:
            phi_s = jnp.where(cosine > th, phi_s, scaled - s_mm)

        tm_blk, tn_blk = cosine.shape
        # Global class index of each lane; the class axis is grid axis 0.
        col = (lax.broadcasted_iota(jnp.int32, (tm_blk, tn_blk), 1)
               + pl.program_id(0) * tn)
        hit = col == label_ref[...]            # (tm, 1) int32 broadcasts over lanes
        out_ref[...] = jnp.where(hit, phi_s, scaled)

    def eval_kernel(xn_ref, wn_ref, out_ref):
        out_ref[...] = _cosine(xn_ref, wn_ref) * s

    return train_kernel, eval_kernel


def arc_margin_product(x, weight, label=None, *, s=30.0, m=0.5,
                       easy_margin=False, training=True,
                       tm=256, tn=1024, mxu_dtype=jnp.bfloat16):
    """Forward of ArcMarginProduct as a tiled pallas_call.

    x:      (B, in_features)
    weight: (out_features, in_features)   (PyTorch layout)
    label:  (B,) int   (required when training=True)

    mxu_dtype=jnp.bfloat16 is the performance default (f32 accumulate);
    pass jnp.float32 for bit-accurate validation against the f32 reference.
    """
    B, in_features = x.shape
    out_features, in_features_w = weight.shape
    assert in_features == in_features_w
    eps = 1e-12  # F.normalize default eps (applied to the L2 norm)

    # ---- hoisted normalization: one XLA pass, kernel sees unit-norm rows ----
    # x / max(||x||, eps) == x * rsqrt(max(||x||^2, eps^2)); normalize in f32
    # BEFORE the mxu_dtype cast (numerically safer than post-matmul scaling).
    x32 = x.astype(jnp.float32)
    w32 = weight.astype(jnp.float32)
    inv_x = lax.rsqrt(jnp.maximum(jnp.sum(x32 * x32, axis=-1, keepdims=True),
                                  eps * eps))
    inv_w = lax.rsqrt(jnp.maximum(jnp.sum(w32 * w32, axis=-1, keepdims=True),
                                  eps * eps))
    xn = (x32 * inv_x).astype(mxu_dtype)                       # (B, K)
    wn_t = jnp.transpose(w32 * inv_w).astype(mxu_dtype)        # (K, N) MXU-canonical

    # ---- tiling: lane-dense (x128) class tiles, sublane-aligned (x8) batch ---
    n128 = _round_up(out_features, 128)     # minimal class padding
    b8 = _round_up(B, 8)
    tm = min(tm, b8)
    tn = min(tn, n128)
    b_pad = _round_up(b8, tm)
    n_pad = _round_up(n128, tn)

    if b_pad != B:
        xn = jnp.pad(xn, ((0, b_pad - B), (0, 0)))
    if n_pad != out_features:
        wn_t = jnp.pad(wn_t, ((0, 0), (0, n_pad - out_features)))

    # Grid = (class tiles, batch tiles).  w_spec depends only on the OUTER axis
    # -> each weight slab is read from HBM exactly once and kept resident while
    # the inner batch axis revisits it.
    grid = (n_pad // tn, b_pad // tm)

    # VMEM budget: double-buffered (w tile + x tile + out tile) + headroom,
    # capped at 48 MiB (safe on v7x's 64 MiB/TC, fine on v5e/v6e).
    # TODO(synk): for very large in_features a K grid axis would be needed.
    in_bytes = jnp.dtype(mxu_dtype).itemsize
    vmem_need = 2 * (tn * in_features * in_bytes
                     + tm * in_features * in_bytes
                     + tm * tn * 4) + (4 << 20)
    vmem_limit = int(max(32 << 20, min(vmem_need, 48 << 20)))

    compiler_params = pltpu.CompilerParams(
        # Outer (class) axis parallel: megacore shards the weight stream.
        # Inner (batch) axis arbitrary: sequential revisits skip the weight DMA.
        dimension_semantics=("parallel", "arbitrary"),
        vmem_limit_bytes=vmem_limit,
    )

    x_spec = pl.BlockSpec((tm, in_features), lambda j, i: (i, 0))
    w_spec = pl.BlockSpec((in_features, tn), lambda j, i: (0, j))
    out_spec = pl.BlockSpec((tm, tn), lambda j, i: (i, j))
    out_shape = jax.ShapeDtypeStruct((b_pad, n_pad), jnp.float32)

    train_kernel, eval_kernel = _make_kernels(s, m, easy_margin, tn)

    if training:
        assert label is not None
        label2d = label.reshape(B, 1).astype(jnp.int32)
        if b_pad != B:
            # Padded batch rows get label=-1 -> never match any class column.
            label2d = jnp.pad(label2d, ((0, b_pad - B), (0, 0)),
                              constant_values=-1)
        lbl_spec = pl.BlockSpec((tm, 1), lambda j, i: (i, 0))
        out = pl.pallas_call(
            train_kernel,
            out_shape=out_shape,
            grid=grid,
            in_specs=[x_spec, w_spec, lbl_spec],
            out_specs=out_spec,
            compiler_params=compiler_params,
        )(xn, wn_t, label2d)
    else:
        out = pl.pallas_call(
            eval_kernel,
            out_shape=out_shape,
            grid=grid,
            in_specs=[x_spec, w_spec],
            out_specs=out_spec,
            compiler_params=compiler_params,
        )(xn, wn_t)

    if b_pad != B or n_pad != out_features:
        out = out[:B, :out_features]
    return out


def _reference(x, weight, label, *, s=30.0, m=0.5, easy_margin=False,
               training=True):
    eps = 1e-12
    xn = x / jnp.maximum(jnp.linalg.norm(x, axis=1, keepdims=True), eps)
    wn = weight / jnp.maximum(jnp.linalg.norm(weight, axis=1, keepdims=True), eps)
    cosine = xn @ wn.T
    if not training:
        return s * cosine
    sine = jnp.sqrt(jnp.clip(1.0 - cosine ** 2, 0.0, 1.0))
    phi = cosine * math.cos(m) - sine * math.sin(m)
    if easy_margin:
        phi = jnp.where(cosine > 0.0, phi, cosine)
    else:
        phi = jnp.where(cosine > math.cos(math.pi - m), phi,
                        cosine - math.sin(math.pi - m) * m)
    one_hot = jax.nn.one_hot(label, cosine.shape[1], dtype=jnp.float32)
    return (one_hot * phi + (1.0 - one_hot) * cosine) * s


def _check(name, got, want, rtol=1e-4, atol=1e-4):
    if not np.allclose(np.asarray(got), np.asarray(want), rtol=rtol, atol=atol):
        raise AssertionError(f"Pallas kernel mismatch vs reference: {name}")


if __name__ == "__main__":
    key = jax.random.PRNGKey(0)
    k_x, k_w, k_l, k_x2, k_w2, k_l2 = jax.random.split(key, 6)

    # --- case 1: module-sized toy shapes (single-tile grid after padding) ---
    B, in_features, out_features = 8, 32, 16
    bound = math.sqrt(6.0 / (in_features + out_features))  # xavier_uniform_
    weight = jax.random.uniform(k_w, (out_features, in_features),
                                minval=-bound, maxval=bound, dtype=jnp.float32)
    x = jax.random.normal(k_x, (B, in_features), dtype=jnp.float32)
    label = jax.random.randint(k_l, (B,), 0, out_features, dtype=jnp.int32)

    out = jax.block_until_ready(
        arc_margin_product(x, weight, label, s=30.0, m=0.5, easy_margin=False,
                           training=True, mxu_dtype=jnp.float32))
    _check("train_f32", out, _reference(x, weight, label, training=True))

    out_eval = jax.block_until_ready(
        arc_margin_product(x, weight, training=False, mxu_dtype=jnp.float32))
    _check("eval_f32", out_eval, _reference(x, weight, label, training=False))

    # --- case 2: multi-tile grid (exercises j*tn iota offset, weight reuse,
    #             batch/class padding) ---
    B2, in2, out2 = 16, 64, 300
    bound2 = math.sqrt(6.0 / (in2 + out2))
    weight2 = jax.random.uniform(k_w2, (out2, in2), minval=-bound2,
                                 maxval=bound2, dtype=jnp.float32)
    x2 = jax.random.normal(k_x2, (B2, in2), dtype=jnp.float32)
    label2 = jax.random.randint(k_l2, (B2,), 0, out2, dtype=jnp.int32)

    out2_train = jax.block_until_ready(
        arc_margin_product(x2, weight2, label2, training=True,
                           tm=8, tn=128, mxu_dtype=jnp.float32))
    _check("train_multitile_f32", out2_train,
           _reference(x2, weight2, label2, training=True))

    # --- case 3: bf16 MXU performance default (f32 accumulate). Not held to
    #     the 1e-4 check (bf16 rounding of the normalized inputs); verified to
    #     run and stay finite / close to the f32 reference. ---
    out3 = jax.block_until_ready(
        arc_margin_product(x2, weight2, label2, training=True))
    assert out3.shape == (B2, out2)
    assert bool(jnp.all(jnp.isfinite(out3)))

    print("KERNEL_OK")
</pallas_src>

<mosaic_0001>
module attributes {stable_mosaic.version = 11 : i64} {
  func.func @train_kernel(%arg0: i32, %arg1: i32, %arg2: memref<8x32xf32, #tpu.memory_space<vmem>>, %arg3: memref<32x128xf32, #tpu.memory_space<vmem>>, %arg4: memref<8x1xi32, #tpu.memory_space<vmem>>, %arg5: memref<8x128xf32, #tpu.memory_space<vmem>>) attributes {dimension_semantics = [#tpu.dimension_semantics<parallel>, #tpu.dimension_semantics<arbitrary>], iteration_bounds = array<i64: 1, 1>, scalar_prefetch = 0 : i64, scratch_operands = 0 : i64, tpu.core_type = #tpu.core_type<tc>, window_params = [{transform_indices = @transform_0, window_bounds = array<i64: 8, 32>}, {transform_indices = @transform_1, window_bounds = array<i64: 32, 128>}, {transform_indices = @transform_2, window_bounds = array<i64: 8, 1>}, {transform_indices = @transform_3, window_bounds = array<i64: 8, 128>}]} {
    %c0 = arith.constant 0 : index
    %c0_0 = arith.constant 0 : index
    %0 = vector.load %arg2[%c0, %c0_0] : memref<8x32xf32, #tpu.memory_space<vmem>>, vector<8x32xf32>
    %c0_1 = arith.constant 0 : index
    %c0_2 = arith.constant 0 : index
    %1 = vector.load %arg3[%c0_1, %c0_2] : memref<32x128xf32, #tpu.memory_space<vmem>>, vector<32x128xf32>
    %cst = arith.constant dense<0.000000e+00> : vector<8x128xf32>
    %2 = tpu.matmul %0, %1, %cst {dimension_numbers = #tpu.dot_dimension_numbers<[1], [0], [0], [1], [0, 0, 1, 1], [], []>} : vector<8x32xf32>, vector<32x128xf32>, vector<8x128xf32> -> vector<8x128xf32>
    %cst_3 = arith.constant 3.000000e+01 : f32
    %3 = vector.broadcast %cst_3 : f32 to vector<8x128xf32>
    %4 = arith.mulf %2, %3 : vector<8x128xf32>
    %5 = arith.mulf %2, %2 : vector<8x128xf32>
    %cst_4 = arith.constant 1.000000e+00 : f32
    %6 = vector.broadcast %cst_4 : f32 to vector<8x128xf32>
    %7 = arith.subf %6, %5 : vector<8x128xf32>
    %cst_5 = arith.constant 0.000000e+00 : f32
    %8 = vector.broadcast %cst_5 : f32 to vector<8x128xf32>
    %9 = arith.maximumf %7, %8 : vector<8x128xf32>
    %10 = math.sqrt %9 : vector<8x128xf32>
    %cst_6 = arith.constant 26.3274765 : f32
    %11 = vector.broadcast %cst_6 : f32 to vector<8x128xf32>
    %12 = arith.mulf %2, %11 : vector<8x128xf32>
    %cst_7 = arith.constant 14.3827658 : f32
    %13 = vector.broadcast %cst_7 : f32 to vector<8x128xf32>
    %14 = arith.mulf %10, %13 : vector<8x128xf32>
    %15 = arith.subf %12, %14 : vector<8x128xf32>
    %cst_8 = arith.constant -0.87758255 : f32
    %16 = vector.broadcast %cst_8 : f32 to vector<8x128xf32>
    %17 = arith.cmpf ogt, %2, %16 : vector<8x128xf32>
    %cst_9 = arith.constant 7.19138288 : f32
    %18 = vector.broadcast %cst_9 : f32 to vector<8x128xf32>
    %19 = arith.subf %4, %18 : vector<8x128xf32>
    %20 = arith.select %17, %15, %19 : vector<8x128xi1>, vector<8x128xf32>
    %21 = tpu.iota {dimensions = array<i32: 1>} : vector<8x128xi32>
    %c128_i32 = arith.constant 128 : i32
    %22 = arith.muli %arg0, %c128_i32 : i32
    %23 = vector.broadcast %22 : i32 to vector<8x128xi32>
    %24 = arith.addi %21, %23 : vector<8x128xi32>
    %c0_10 = arith.constant 0 : index
    %c0_11 = arith.constant 0 : index
    %25 = vector.load %arg4[%c0_10, %c0_11] : memref<8x1xi32, #tpu.memory_space<vmem>>, vector<8x1xi32>
    %26 = vector.broadcast %25 : vector<8x1xi32> to vector<8x128xi32>
    %27 = arith.cmpi eq, %24, %26 : vector<8x128xi32>
    %28 = arith.select %27, %20, %4 : vector<8x128xi1>, vector<8x128xf32>
    %c0_12 = arith.constant 0 : index
    %c0_13 = arith.constant 0 : index
    %29 = vector.load %arg5[%c0_12, %c0_13] : memref<8x128xf32, #tpu.memory_space<vmem>>, vector<8x128xf32>
    tpu.vector_store %arg5[%c0_12, %c0_13], %28 {strides = array<i32>} : memref<8x128xf32, #tpu.memory_space<vmem>>, vector<8x128xf32>,
    return
  }
  func.func @transform_0(%arg0: i32, %arg1: i32) -> (i32, i32) {
    %c0_i32 = arith.constant 0 : i32
    %c0_i32_0 = arith.constant 0 : i32
    return %arg1, %c0_i32 : i32, i32
  }
  func.func @transform_1(%arg0: i32, %arg1: i32) -> (i32, i32) {
    %c0_i32 = arith.constant 0 : i32
    %c0_i32_0 = arith.constant 0 : i32
    return %c0_i32, %arg0 : i32, i32
  }
  func.func @transform_2(%arg0: i32, %arg1: i32) -> (i32, i32) {
    %c0_i32 = arith.constant 0 : i32
    %c0_i32_0 = arith.constant 0 : i32
    return %arg1, %c0_i32 : i32, i32
  }
  func.func @transform_3(%arg0: i32, %arg1: i32) -> (i32, i32) {
    %c0_i32 = arith.constant 0 : i32
    return %arg1, %arg0 : i32, i32
  }
}

</mosaic_0001>

<bundles_post_ra>
// kernel: tpu_custom_call.1
= control target key start
LH: loop header
LB: loop body
LE: loop exit
PB: predicated region body
PF: predicated region fallthrough
CT: control target
= control target key end

     0   :  { %8 = vsyncpa [#allocation3], 0  ;;  %s263_s0 = inlined_call_operand.vmem [shape: f32[8,32], index: 0, kind: input, shape index: {}]   ;;  %s264_s1 = inlined_call_operand.hbm [shape: f32[32,128], index: 1, kind: input, shape index: {}]   ;;  %s265_s2 = inlined_call_operand.vmem [shape: s32[8,1], index: 2, kind: input, shape index: {}]   ;;  %s266_s3 = inlined_call_operand.hbm [shape: f32[8,128], index: 3, kind: output, shape index: {}]  }
   0x1   :  { %9 = vsyncpa [#allocation4], 0  ;;  %s224_s12 = smov [#allocation2]  }
   0x2   :  { %s17_s13 = sshll.u32 %s224_s12, 4  ;;  %s18_s13 = int_to_ptr.vmem [resolvable:$true] %s17_s13 }
   0x3   :  { %s188_s14 = scalar_lea.vmem %s18_s13, 512  ;;  %p193_p1 = scmp.lt.s32.totalorder %s18_s13, %s18_s13 }
   0x4   :  { %p189_p0 = scmp.ne.s32.totalorder %s18_s13, %s188_s14  ;;  %p194_p2 = scmp.lt.s32.totalorder %s188_s14, %s188_s14 }
   0x6   :  { %p195_p3 = por %p194_p2, %p193_p1 }
   0x8   :  { %p196_p4 = pnand %p195_p3, %p189_p0 }
   0xa   :  { %199 = shalt.err (!%p196_p4)
}
   0xb   :  { %s225_s15 = smov 128   ;;  %s226_s16 = smov 8  }
   0xc   :  { %23 = dma.hbm_to_vmem [thread:$0]  %s264_s1, 512, %s18_s13, [#allocation3], %s225_s15, %s225_s15, %s226_s16  }
   0xd   :  { %220 = dma.done.wait [#allocation3], 512  }
   0xe   :  { %221 = vsyncadd [#allocation3], 4294966784  ;;  %v227_v0 = vmov 0.0   ;;  %vm228_vm0 = vmmov 0   ;;  %v229_v1 = vmov 0   ;;  %v33_v2 = vld [vmem:[#allocation2 + $0x18] sm:$0xff]  ;;  %v125_v13 = vlaneseq }
   0xf   :  { %159 = vmatprep.subr.mxu0 %v227_v0  ;;  %167 = vmatprep.mubr.msk.f32.mxu0 %vm228_vm0, %v227_v0  ;;  %v32_v3 = vld [vmem:[#allocation2 + $0x10] sm:$0xff]  ;;  %v130_v4 = vld [vmem:[%s265_s2] sm:$0xff]  ;;  %v31_v5 = vld [vmem:[#allocation2 + $0x8] sm:$0xff]  ;;  %vm34_vm1 = vcmask 261120  }
  0x10   :  { %177 = vset.pattern.permute.xlu0 %v229_v1  ;;  %160 = vmatpush3.msra.mxu0 %v33_v2  ;;  %v30_v6 = vld [vmem:[#allocation2] sm:$0xff]  ;;  %v126_v19 = vand.u32 127, %v125_v13 }
  0x11   :  { %161 = vmatprep.subr.mxu0 %v227_v0  ;;  %132 = vperm.xlu0 %177, %v130_v4   ;;  %v29_v7 = vld [vmem:[%s263_s0] sm:$0xff]  ;;  %s230_s0 = smov [#allocation5]  }
  0x12   :  { %162 = vmatpush3.msra.mxu0 %v32_v3  ;;  %s143_s2 = sshll.u32 %s230_s0, 4  ;;  %s144_s2 = int_to_ptr.vmem [resolvable:$true] %s143_s2 }
  0x13   :  { %163 = vmatprep.subr.mxu0 %v227_v0  ;;  %s200_s22 = scalar_lea.vmem %s144_s2, 128  ;;  %p205_p6 = scmp.lt.s32.totalorder %s144_s2, %s144_s2 }
  0x14   :  { %164 = vmatpush3.msra.mxu0 %v31_v5  ;;  %p201_p5 = scmp.ne.s32.totalorder %s144_s2, %s200_s22  ;;  %p206_p7 = scmp.lt.s32.totalorder %s200_s22, %s200_s22 }
  0x15   :  { %165 = vmatprep.subr.mxu0 %v227_v0 }
  0x16   :  { %166 = vmatpush3.msra.mxu0 %v30_v6  ;;  %p207_p8 = por %p206_p7, %p205_p6 }
  0x17   :  { %168 = vmatmul.mubr.msk.f32.vlgmr.msra.gmra.mxu0 %vm34_vm1, %v29_v7 }
  0x18   :  { %p208_p9 = pnand %p207_p8, %p201_p5 }
  0x8c   :  { %v133_v21 = vpop.permute.xlu0 %132 }
  0x8d   :  { %vm134_vm4 = vcmp.eq.s32.totalorder %v126_v19, %v133_v21 }
  0xd7   :  { %v104_v8 = vpop.f32.mrf.mxu0 }
  0xd8   :  { %v109_v9 = vmul.f32 %v104_v8, %v104_v8  ;;  %v108_v17 = vmul.f32 30.0, %v104_v8  ;;  %v119_v22 = vmul.f32 26.327477, %v104_v8  ;;  %vm122_vm5 = vcmp.gt.f32.partialorder %v104_v8, -0.87758255 }
  0xd9   :  { %v169_v10 = vpop.f32.mrf.mxu0 }
  0xda   :  { %v110_v11 = vsub.f32 1.0, %v109_v9  ;;  %v153_v25 = vadd.f32 -7.191383, %v108_v17 }
  0xdc   :  { %v111_v12 = vmax.f32 %v110_v11, 0.0 }
  0xde   :  { %178 = vrsqrt.f32 %v111_v12  ;;  %vm114_vm2 = vcmp.eq.f32.partialorder %v111_v12, inf  ;;  %v117_v16 = vand.u32 2147483648, %v111_v12  ;;  %vm116_vm3 = vcmp.eq.f32.partialorder %v111_v12, 0.0 }
  0xeb   :  { %v179_v14 = vpop.eup %178 }
  0xec   :  { %v113_v15 = vmul.f32 %v179_v14, %v111_v12 }
  0xee   :  { %v115_v18 = vsel %vm114_vm2, %v111_v12, %v113_v15 }
  0xef   :  { %v118_v20 = vsel %vm116_vm3, %v117_v16, %v115_v18 }
  0xf0   :  { %v120_v23 = vmul.f32 14.382766, %v118_v20 }
  0xf2   :  { %v121_v24 = vsub.f32 %v119_v22, %v120_v23 }
  0xf4   :  { %v124_v26 = vsel %vm122_vm5, %v121_v24, %v153_v25 }
  0xf5   :  { %v135_v27 = vsel %vm134_vm4, %v124_v26, %v108_v17 }
  0xf6   :  { %136 = vst [vmem:[#allocation5] sm:$0xff] %v135_v27 }
  0xf7   :  { %211 = shalt.err (!%p208_p9)
}
  0xf8   :  { %146 = dma.vmem_to_hbm [thread:$0]  %s144_s2, 128, %s266_s3, [#allocation4]  }
  0xf9   :  { %222 = dma.done.wait [#allocation4], 128  }
  0xfa   :  { %223 = vsyncadd [#allocation4], 4294967168 }
  0xfb   :  { %150 = vsyncpa [#allocation3], 1 }
  0xfc   :  { %151 = vsyncpa [#allocation4], 1 }

</bundles_post_ra>
